<compile_context>
chip_gen: v5e
topology: v5e:2x2
jax: 0.10.0
libtpu: 0.0.40
codegen_flags: <defaults>
</compile_context>

<pallas_src>
import jax
import jax.numpy as jnp
from jax.experimental import pallas as pl
from jax.experimental.pallas import tpu as pltpu

LANE = 128


def _round_up(x, m):
    return (x + m - 1) // m * m


# ---------------------------------------------------------------------------
# Kernel 1: hidden GCN layer   H = relu((A @ Z) @ W + b)
# grid = (rows, k);  A tile (TM, TK) bf16, Z tile (TK, Fin) bf16, W/b resident f32
# ---------------------------------------------------------------------------
def gcn_hidden_kernel(a_ref, z_ref, w_ref, b_ref, h_ref, acc_ref):
    k = pl.program_id(1)

    @pl.when(k == 0)
    def _():
        acc_ref[...] = jnp.zeros_like(acc_ref)

    # Aggregation: acc[i] += A[i, k] @ Z[k]   (bf16 operands, f32 MXU accumulate)
    acc_ref[...] += jnp.dot(a_ref[...], z_ref[...],
                            preferred_element_type=jnp.float32)

    @pl.when(k == pl.num_programs(1) - 1)
    def _():
        h = jnp.dot(acc_ref[...], w_ref[...],
                    preferred_element_type=jnp.float32) + b_ref[...]
        h = jnp.maximum(h, 0.0)
        # dropout_layer: identity in eval mode
        # TODO(synk): training-mode dropout (pltpu.prng_random_bits mask) not emitted.
        h_ref[...] = h.astype(h_ref.dtype)


# ---------------------------------------------------------------------------
# Kernel 2: last GCN layer fused with Linear head + log_softmax
#   out = log_softmax(relu((A @ H1) @ W2 + b2) @ Wo + bo)
# Padded class columns are killed by bo padding == -1e30.
# ---------------------------------------------------------------------------
def gcn_output_kernel(a_ref, h1_ref, w2_ref, b2_ref, wo_ref, bo_ref,
                      out_ref, acc_ref):
    k = pl.program_id(1)

    @pl.when(k == 0)
    def _():
        acc_ref[...] = jnp.zeros_like(acc_ref)

    acc_ref[...] += jnp.dot(a_ref[...], h1_ref[...],
                            preferred_element_type=jnp.float32)

    @pl.when(k == pl.num_programs(1) - 1)
    def _():
        h = jnp.dot(acc_ref[...], w2_ref[...],
                    preferred_element_type=jnp.float32) + b2_ref[...]
        h = jnp.maximum(h, 0.0)
        logits = jnp.dot(h, wo_ref[...],
                         preferred_element_type=jnp.float32) + bo_ref[...]
        m = jnp.max(logits, axis=1, keepdims=True)
        z = logits - m
        lse = jnp.log(jnp.sum(jnp.exp(z), axis=1, keepdims=True))
        out_ref[...] = z - lse


# ---------------------------------------------------------------------------
# pallas_call wrappers
# ---------------------------------------------------------------------------
def _compiler_params():
    return pltpu.CompilerParams(
        dimension_semantics=("parallel", "arbitrary"),
        vmem_limit_bytes=32 * 1024 * 1024,  # safe on v5e/v6e/v7x for these tiles
    )


def _gcn_hidden_layer(a_p, z_p, w_p, b_p, *, tm, tk):
    n_pad = a_p.shape[0]
    fin = z_p.shape[1]
    fout = w_p.shape[1]
    return pl.pallas_call(
        gcn_hidden_kernel,
        out_shape=jax.ShapeDtypeStruct((n_pad, fout), jnp.bfloat16),
        grid=(n_pad // tm, n_pad // tk),
        in_specs=[
            pl.BlockSpec((tm, tk), lambda i, k: (i, k)),     # A_hat tile (streamed)
            pl.BlockSpec((tk, fin), lambda i, k: (k, 0)),    # X row-block (streamed)
            pl.BlockSpec((fin, fout), lambda i, k: (0, 0)),  # W1 resident
            pl.BlockSpec((1, fout), lambda i, k: (0, 0)),    # b1 resident
        ],
        out_specs=pl.BlockSpec((tm, fout), lambda i, k: (i, 0)),
        scratch_shapes=[pltpu.VMEM((tm, fin), jnp.float32)],
        compiler_params=_compiler_params(),
    )(a_p, z_p, w_p, b_p)


def _gcn_output_layer(a_p, h1_p, w2_p, b2_p, wo_p, bo_p, *, tm, tk):
    n_pad = a_p.shape[0]
    dh_p = h1_p.shape[1]
    dout_p = wo_p.shape[1]
    return pl.pallas_call(
        gcn_output_kernel,
        out_shape=jax.ShapeDtypeStruct((n_pad, dout_p), jnp.float32),
        grid=(n_pad // tm, n_pad // tk),
        in_specs=[
            pl.BlockSpec((tm, tk), lambda i, k: (i, k)),        # A_hat tile
            pl.BlockSpec((tk, dh_p), lambda i, k: (k, 0)),      # H1 row-block
            pl.BlockSpec((dh_p, dh_p), lambda i, k: (0, 0)),    # W2 resident
            pl.BlockSpec((1, dh_p), lambda i, k: (0, 0)),       # b2 resident
            pl.BlockSpec((dh_p, dout_p), lambda i, k: (0, 0)),  # Wo resident
            pl.BlockSpec((1, dout_p), lambda i, k: (0, 0)),     # bo resident
        ],
        out_specs=pl.BlockSpec((tm, dout_p), lambda i, k: (i, 0)),
        scratch_shapes=[pltpu.VMEM((tm, dh_p), jnp.float32)],
        compiler_params=_compiler_params(),
    )(a_p, h1_p, w2_p, b2_p, wo_p, bo_p)


def gcn_classifier_forward(a_hat, x, params, *, tm=256, tk=512):
    """Full forward.  a_hat: [N,N] f32 normalized adjacency, x: [N,din] f32."""
    w1, b1, w2, b2, wo, bo = params
    N, din = x.shape
    dh = w1.shape[1]
    dout = wo.shape[1]

    din_p = _round_up(din, LANE)
    dh_p = _round_up(dh, LANE)
    dout_p = _round_up(dout, LANE)

    # Node-row padding / tile selection.  n_pad must be an exact multiple of
    # BOTH tm and tk (shrink the tiles to LANE-multiple divisors of n_pad so
    # every node row is covered by exactly one row tile and one k tile).
    n_pad = _round_up(N, LANE)
    tm = min(tm, n_pad)
    tk = min(tk, n_pad)
    while n_pad % tm:
        tm -= LANE
    while n_pad % tk:
        tk -= LANE

    # Pad operands: A_hat & activations to bf16 (streamed), weights/biases f32.
    a_p = jnp.zeros((n_pad, n_pad), jnp.bfloat16).at[:N, :N].set(
        a_hat.astype(jnp.bfloat16))
    x_p = jnp.zeros((n_pad, din_p), jnp.bfloat16).at[:N, :din].set(
        x.astype(jnp.bfloat16))
    w1_p = jnp.zeros((din_p, dh_p), jnp.float32).at[:din, :dh].set(w1)
    b1_p = jnp.zeros((1, dh_p), jnp.float32).at[:, :dh].set(b1)
    w2_p = jnp.zeros((dh_p, dh_p), jnp.float32).at[:dh, :dh].set(w2)
    b2_p = jnp.zeros((1, dh_p), jnp.float32).at[:, :dh].set(b2)
    wo_p = jnp.zeros((dh_p, dout_p), jnp.float32).at[:dh, :dout].set(wo)
    # Padded class columns get -1e30 bias -> contribute 0 to the softmax sum.
    bo_p = jnp.full((1, dout_p), -1e30, jnp.float32).at[:, :dout].set(bo)

    h1 = _gcn_hidden_layer(a_p, x_p, w1_p, b1_p, tm=tm, tk=tk)
    out_p = _gcn_output_layer(a_p, h1, w2_p, b2_p, wo_p, bo_p, tm=tm, tk=tk)
    return out_p[:N, :dout]


# ---------------------------------------------------------------------------
# Glue: normalized adjacency from edge_index (plain JAX, not hot path)
# TODO(synk): for large sparse graphs, replace the dense A_hat stream with a
#             CSR row-blocked aggregation driven by PrefetchScalarGridSpec.
# ---------------------------------------------------------------------------
def build_normalized_adjacency(edge_index, num_nodes):
    """A_hat = D^{-1/2} (A + I_remaining) D^{-1/2}; A[dst, src] summed per edge."""
    src, dst = edge_index[0], edge_index[1]
    A = jnp.zeros((num_nodes, num_nodes), jnp.float32)
    A = A.at[dst, src].add(1.0)                              # sum duplicate edges
    diag = jnp.diagonal(A)
    A = A + jnp.diag(jnp.where(diag > 0, 0.0, 1.0))          # add_remaining_self_loops
    deg = jnp.sum(A, axis=1)
    d_inv_sqrt = jnp.where(deg > 0, 1.0 / jnp.sqrt(deg), 0.0)
    return d_inv_sqrt[:, None] * A * d_inv_sqrt[None, :]


def init_params(key, dim_in, dim_h, dim_out):
    """Deterministic init matching GCNClassifier parameter shapes."""
    k1, k2, k3, k4 = jax.random.split(key, 4)

    def glorot(k, fan_in, fan_out):
        lim = jnp.sqrt(6.0 / (fan_in + fan_out))
        return jax.random.uniform(k, (fan_in, fan_out), jnp.float32, -lim, lim)

    w1 = glorot(k1, dim_in, dim_h)
    b1 = jnp.zeros((1, dim_h), jnp.float32)
    w2 = glorot(k2, dim_h, dim_h)
    b2 = jnp.zeros((1, dim_h), jnp.float32)
    lim = 1.0 / jnp.sqrt(dim_h)
    wo = jax.random.uniform(k3, (dim_h, dim_out), jnp.float32, -lim, lim)
    bo = jax.random.uniform(k4, (1, dim_out), jnp.float32, -lim, lim)
    return (w1, b1, w2, b2, wo, bo)


# ---------------------------------------------------------------------------
# Pure-JAX f32 reference for correctness check
# ---------------------------------------------------------------------------
def reference_forward(a_hat, x, params):
    w1, b1, w2, b2, wo, bo = params
    h = jnp.maximum((a_hat @ x) @ w1 + b1, 0.0)
    h = jnp.maximum((a_hat @ h) @ w2 + b2, 0.0)
    logits = h @ wo + bo
    return jax.nn.log_softmax(logits, axis=1)


if __name__ == "__main__":
    key = jax.random.PRNGKey(0)
    k_x, k_e, k_p = jax.random.split(key, 3)

    N, E = 16, 40            # small graph: 16 nodes, 40 directed edges
    dim_in, dim_h, dim_out = 8, 32, 4

    x = jax.random.normal(k_x, (N, dim_in), jnp.float32)
    edge_index = jax.random.randint(k_e, (2, E), 0, N, jnp.int32)

    a_hat = build_normalized_adjacency(edge_index, N)
    params = init_params(k_p, dim_in, dim_h, dim_out)

    out = gcn_classifier_forward(a_hat, x, params)
    out = jax.block_until_ready(out)

    ref = reference_forward(a_hat, x, params)
    assert out.shape == (N, dim_out)
    # bf16 streaming of A_hat / activations (f32 accumulation) -> relaxed tol
    assert jnp.allclose(out, ref, atol=5e-2, rtol=5e-2), "mismatch vs reference"
    assert jnp.array_equal(jnp.argmax(out, axis=1), jnp.argmax(ref, axis=1))

    print("KERNEL_OK")
</pallas_src>

<mosaic_0001>
module attributes {stable_mosaic.version = 11 : i64} {
  func.func @gcn_hidden_kernel(%arg0: i32, %arg1: i32, %arg2: memref<128x128xbf16, #tpu.memory_space<vmem>>, %arg3: memref<128x128xbf16, #tpu.memory_space<vmem>>, %arg4: memref<128x128xf32, #tpu.memory_space<vmem>>, %arg5: memref<1x128xf32, #tpu.memory_space<vmem>>, %arg6: memref<128x128xbf16, #tpu.memory_space<vmem>>, %arg7: memref<128x128xf32, #tpu.memory_space<vmem>>) attributes {dimension_semantics = [#tpu.dimension_semantics<parallel>, #tpu.dimension_semantics<arbitrary>], iteration_bounds = array<i64: 1, 1>, scalar_prefetch = 0 : i64, scratch_operands = 1 : i64, tpu.core_type = #tpu.core_type<tc>, window_params = [{transform_indices = @transform_0, window_bounds = array<i64: 128, 128>}, {transform_indices = @transform_1, window_bounds = array<i64: 128, 128>}, {pipeline_mode = #tpu.pipeline_mode<synchronous>, transform_indices = @transform_2, window_bounds = array<i64: 128, 128>}, {pipeline_mode = #tpu.pipeline_mode<synchronous>, transform_indices = @transform_3, window_bounds = array<i64: 1, 128>}, {transform_indices = @transform_4, window_bounds = array<i64: 128, 128>}]} {
    %c0_i32 = arith.constant 0 : i32
    %0 = arith.cmpi eq, %arg1, %c0_i32 : i32
    %1 = arith.extui %0 : i1 to i32
    %c0_i32_0 = arith.constant 0 : i32
    %2 = arith.cmpi ne, %1, %c0_i32_0 : i32
    scf.if %2 {
      %cst_10 = arith.constant 0.000000e+00 : f32
      %12 = vector.broadcast %cst_10 : f32 to vector<128x128xf32>
      %c0_11 = arith.constant 0 : index
      %c0_12 = arith.constant 0 : index
      %13 = vector.load %arg7[%c0_11, %c0_12] : memref<128x128xf32, #tpu.memory_space<vmem>>, vector<128x128xf32>
      tpu.vector_store %arg7[%c0_11, %c0_12], %12 {strides = array<i32>} : memref<128x128xf32, #tpu.memory_space<vmem>>, vector<128x128xf32>,
    } else {
    }
    %c0 = arith.constant 0 : index
    %c0_1 = arith.constant 0 : index
    %3 = vector.load %arg7[%c0, %c0_1] : memref<128x128xf32, #tpu.memory_space<vmem>>, vector<128x128xf32>
    %c0_2 = arith.constant 0 : index
    %c0_3 = arith.constant 0 : index
    %4 = vector.load %arg2[%c0_2, %c0_3] : memref<128x128xbf16, #tpu.memory_space<vmem>>, vector<128x128xbf16>
    %c0_4 = arith.constant 0 : index
    %c0_5 = arith.constant 0 : index
    %5 = vector.load %arg3[%c0_4, %c0_5] : memref<128x128xbf16, #tpu.memory_space<vmem>>, vector<128x128xbf16>
    %cst = arith.constant dense<0.000000e+00> : vector<128x128xf32>
    %6 = tpu.matmul %4, %5, %cst {dimension_numbers = #tpu.dot_dimension_numbers<[1], [0], [0], [1], [0, 0, 1, 1], [], []>} : vector<128x128xbf16>, vector<128x128xbf16>, vector<128x128xf32> -> vector<128x128xf32>
    %7 = arith.addf %3, %6 : vector<128x128xf32>
    %c0_6 = arith.constant 0 : index
    %c0_7 = arith.constant 0 : index
    %8 = vector.load %arg7[%c0_6, %c0_7] : memref<128x128xf32, #tpu.memory_space<vmem>>, vector<128x128xf32>
    tpu.vector_store %arg7[%c0_6, %c0_7], %7 {strides = array<i32>} : memref<128x128xf32, #tpu.memory_space<vmem>>, vector<128x128xf32>,
    %c0_i32_8 = arith.constant 0 : i32
    %9 = arith.cmpi eq, %arg1, %c0_i32_8 : i32
    %10 = arith.extui %9 : i1 to i32
    %c0_i32_9 = arith.constant 0 : i32
    %11 = arith.cmpi ne, %10, %c0_i32_9 : i32
    scf.if %11 {
      %c0_10 = arith.constant 0 : index
      %c0_11 = arith.constant 0 : index
      %12 = vector.load %arg7[%c0_10, %c0_11] : memref<128x128xf32, #tpu.memory_space<vmem>>, vector<128x128xf32>
      %c0_12 = arith.constant 0 : index
      %c0_13 = arith.constant 0 : index
      %13 = vector.load %arg4[%c0_12, %c0_13] : memref<128x128xf32, #tpu.memory_space<vmem>>, vector<128x128xf32>
      %cst_14 = arith.constant dense<0.000000e+00> : vector<128x128xf32>
      %14 = tpu.matmul %12, %13, %cst_14 {dimension_numbers = #tpu.dot_dimension_numbers<[1], [0], [0], [1], [0, 0, 1, 1], [], []>} : vector<128x128xf32>, vector<128x128xf32>, vector<128x128xf32> -> vector<128x128xf32>
      %c0_15 = arith.constant 0 : index
      %c0_16 = arith.constant 0 : index
      %15 = vector.load %arg5[%c0_15, %c0_16] : memref<1x128xf32, #tpu.memory_space<vmem>>, vector<1x128xf32>
      %16 = vector.broadcast %15 : vector<1x128xf32> to vector<128x128xf32>
      %17 = arith.addf %14, %16 : vector<128x128xf32>
      %cst_17 = arith.constant 0.000000e+00 : f32
      %18 = vector.broadcast %cst_17 : f32 to vector<128x128xf32>
      %19 = arith.maximumf %17, %18 : vector<128x128xf32>
      %20 = arith.truncf %19 : vector<128x128xf32> to vector<128x128xbf16>
      %c0_18 = arith.constant 0 : index
      %c0_19 = arith.constant 0 : index
      %21 = vector.load %arg6[%c0_18, %c0_19] : memref<128x128xbf16, #tpu.memory_space<vmem>>, vector<128x128xbf16>
      tpu.vector_store %arg6[%c0_18, %c0_19], %20 {strides = array<i32>} : memref<128x128xbf16, #tpu.memory_space<vmem>>, vector<128x128xbf16>,
    } else {
    }
    return
  }
  func.func @transform_0(%arg0: i32, %arg1: i32) -> (i32, i32) {
    %c0_i32 = arith.constant 0 : i32
    return %arg0, %arg1 : i32, i32
  }
  func.func @transform_1(%arg0: i32, %arg1: i32) -> (i32, i32) {
    %c0_i32 = arith.constant 0 : i32
    %c0_i32_0 = arith.constant 0 : i32
    return %arg1, %c0_i32 : i32, i32
  }
  func.func @transform_2(%arg0: i32, %arg1: i32) -> (i32, i32) {
    %c0_i32 = arith.constant 0 : i32
    %c0_i32_0 = arith.constant 0 : i32
    %c0_i32_1 = arith.constant 0 : i32
    return %c0_i32, %c0_i32_0 : i32, i32
  }
  func.func @transform_3(%arg0: i32, %arg1: i32) -> (i32, i32) {
    %c0_i32 = arith.constant 0 : i32
    %c0_i32_0 = arith.constant 0 : i32
    %c0_i32_1 = arith.constant 0 : i32
    return %c0_i32, %c0_i32_0 : i32, i32
  }
  func.func @transform_4(%arg0: i32, %arg1: i32) -> (i32, i32) {
    %c0_i32 = arith.constant 0 : i32
    %c0_i32_0 = arith.constant 0 : i32
    return %arg0, %c0_i32 : i32, i32
  }
}

</mosaic_0001>

<bundles_post_ra>
// kernel: tpu_custom_call.1
= control target key start
LH: loop header
LB: loop body
LE: loop exit
PB: predicated region body
PF: predicated region fallthrough
CT: control target
= control target key end

     0   :  { %9 = vsyncpa [#allocation4], 0  ;;  %s801_s0 = inlined_call_operand.hbm [shape: bf16[128,128], index: 0, kind: input, shape index: {}]   ;;  %s802_s1 = inlined_call_operand.hbm [shape: bf16[128,128], index: 1, kind: input, shape index: {}]   ;;  %s803_s2 = inlined_call_operand.hbm [shape: f32[128,128], index: 2, kind: input, shape index: {}]   ;;  %s804_s3 = inlined_call_operand.vmem [shape: f32[1,128], index: 3, kind: input, shape index: {}]   ;;  %s805_s4 = inlined_call_operand.hbm [shape: bf16[128,128], index: 4, kind: output, shape index: {}]  }
   0x1   :  { %10 = vsyncpa [#allocation7], 0 }
   0x2   :  { %11 = vsyncpa [#allocation5], 0  ;;  %s29_s17 = sshll.u32 %s802_s1, 4  ;;  %s744_s18 = smov [#allocation6]   ;;  %s30_s17 = int_to_ptr.hbm [resolvable:$true] %s29_s17 }
   0x3   :  { %s31_s19 = sshll.u32 %s744_s18, 4  ;;  %s16_s22 = sshll.u32 %s801_s0, 4  ;;  %s32_s19 = int_to_ptr.vmem [resolvable:$true] %s31_s19  ;;  %s17_s22 = int_to_ptr.hbm [resolvable:$true] %s16_s22 }
   0x4   :  { %s745_s23 = smov 64   ;;  %s746_s24 = smov 4  }
   0x5   :  { %37 = dma.hbm_to_vmem [thread:$0]  %s30_s17, 1024, %s32_s19, [#allocation7], %s745_s23, %s745_s23, %s746_s24  }
   0x6   :  { %s747_s25 = smov [#allocation3]   ;;  %s42_s1 = sshll.u32 %s803_s2, 4  ;;  %s43_s1 = int_to_ptr.hbm [resolvable:$true] %s42_s1 }
   0x7   :  { %s18_s26 = sshll.u32 %s747_s25, 4  ;;  %s748_s0 = smov [#allocation8]   ;;  %s19_s26 = int_to_ptr.vmem [resolvable:$true] %s18_s26 }
   0x8   :  { %24 = dma.hbm_to_vmem [thread:$0]  %s17_s22, 1024, %s19_s26, [#allocation4], %s745_s23, %s745_s23, %s746_s24  }
   0x9   :  { %s44_s29 = sshll.u32 %s748_s0, 4  ;;  %s749_s30 = smov 128   ;;  %s45_s29 = int_to_ptr.vmem [resolvable:$true] %s44_s29 }
   0xa   :  { %s750_s5 = smov 8  }
   0xb   :  { %50 = dma.hbm_to_vmem [thread:$0]  %s43_s1, 2048, %s45_s29, [#allocation7], %s749_s30, %s749_s30, %s750_s5  }
   0xc   :  { %738 = dma.done.wait [#allocation4], 1024  }
   0xd   :  { %739 = vsyncadd [#allocation4], 4294966272 }
   0xe   :  { %740 = dma.done.wait [#allocation7], 3072  }
   0xf   :  { %741 = vsyncadd [#allocation7], 4294964224  ;;  %v561_v0 = vld [vmem:[#allocation6 + $0x38] sm:$0xff]  ;;  %v560_v1 = vld [vmem:[#allocation6 + $0x30] sm:$0xff]  ;;  %s468_s10 = sshll.u32 %s805_s4, 4  ;;  %s469_s10 = int_to_ptr.hbm [resolvable:$true] %s468_s10 }
  0x10   :  { %609 = vmatpush.bf16.msra.mxu2 %v561_v0  ;;  %229 = vmatpush.bf16.msra.mxu0 %v561_v0  ;;  %v559_v2 = vld [vmem:[#allocation6 + $0x28] sm:$0xff]  ;;  %v558_v3 = vld [vmem:[#allocation6 + $0x20] sm:$0xff]  ;;  %v557_v4 = vld [vmem:[#allocation6 + $0x18] sm:$0xff] }
  0x11   :  { %v556_v5 = vld [vmem:[#allocation6 + $0x10] sm:$0xff]  ;;  %v555_v6 = vld [vmem:[#allocation6 + $0x8] sm:$0xff]  ;;  %v554_v7 = vld [vmem:[#allocation6] sm:$0xff] }
  0x12   :  { %v550_v8 = vld [vmem:[#allocation3 + $0x20] sm:$0xff]  ;;  %v551_v10 = vld [vmem:[#allocation3 + $0x28] sm:$0xff]  ;;  %v344_v12 = vld [vmem:[#allocation8 + $0x78] sm:$0xff] }
  0x13   :  { %v546_v9 = vld [vmem:[#allocation3] sm:$0xff]  ;;  %v547_v11 = vld [vmem:[#allocation3 + $0x8] sm:$0xff]  ;;  %v343_v13 = vld [vmem:[#allocation8 + $0x70] sm:$0xff]  ;;  %349 = vmatpush.msra.mxu1 %v344_v12  ;;  %617 = vmatpush.msra.mxu3 %v344_v12 }
  0x14   :  { %610 = vmatpush.bf16.msra.mxu2 %v560_v1  ;;  %230 = vmatpush.bf16.msra.mxu0 %v560_v1  ;;  %v342_v14 = vld [vmem:[#allocation8 + $0x68] sm:$0xff]  ;;  %v341_v15 = vld [vmem:[#allocation8 + $0x60] sm:$0xff]  ;;  %v340_v16 = vld [vmem:[#allocation8 + $0x58] sm:$0xff] }
  0x15   :  { %350 = vmatpush.msra.mxu1 %v343_v13  ;;  %618 = vmatpush.msra.mxu3 %v343_v13  ;;  %v339_v17 = vld [vmem:[#allocation8 + $0x50] sm:$0xff]  ;;  %v338_v18 = vld [vmem:[#allocation8 + $0x48] sm:$0xff]  ;;  %v337_v21 = vld [vmem:[#allocation8 + $0x40] sm:$0xff] }
  0x16   :  { %v552_v19 = vld [vmem:[#allocation3 + $0x30] sm:$0xff]  ;;  %v336_v22 = vld [vmem:[#allocation8 + $0x38] sm:$0xff]  ;;  %v334_v24 = vld [vmem:[#allocation8 + $0x28] sm:$0xff] }
  0x17   :  { %351 = vmatpush.msra.mxu1 %v342_v14  ;;  %619 = vmatpush.msra.mxu3 %v342_v14  ;;  %v548_v20 = vld [vmem:[#allocation3 + $0x10] sm:$0xff]  ;;  %v333_v25 = vld [vmem:[#allocation8 + $0x20] sm:$0xff]  ;;  %v332_v26 = vld [vmem:[#allocation8 + $0x18] sm:$0xff] }
  0x18   :  { %611 = vmatpush.bf16.msra.mxu2 %v559_v2  ;;  %231 = vmatpush.bf16.msra.mxu0 %v559_v2  ;;  %v335_v23 = vld [vmem:[#allocation8 + $0x30] sm:$0xff]  ;;  %v330_v28 = vld [vmem:[#allocation8 + $0x8] sm:$0xff]  ;;  %v553_v29 = vld [vmem:[#allocation3 + $0x38] sm:$0xff] }
  0x19   :  { %352 = vmatpush.msra.mxu1 %v341_v15  ;;  %620 = vmatpush.msra.mxu3 %v341_v15  ;;  %v331_v27 = vld [vmem:[#allocation8 + $0x10] sm:$0xff]  ;;  %v549_v30 = vld [vmem:[#allocation3 + $0x18] sm:$0xff]  ;;  %v329_v31 = vld [vmem:[#allocation8] sm:$0xff] }
  0x1a   :  { %v641_v49 = vld [vmem:[%s804_s3] ss:$0 sm:$0xff]  ;;  %s751_s3 = smov [#allocation9]  }
  0x1b   :  { %353 = vmatpush.msra.mxu1 %v340_v16  ;;  %621 = vmatpush.msra.mxu3 %v340_v16  ;;  %s466_s7 = sshll.u32 %s751_s3, 4  ;;  %s467_s7 = int_to_ptr.vmem [resolvable:$true] %s466_s7 }
  0x1c   :  { %612 = vmatpush.bf16.msra.mxu2 %v558_v3  ;;  %232 = vmatpush.bf16.msra.mxu0 %v558_v3 }
  0x1d   :  { %354 = vmatpush.msra.mxu1 %v339_v17  ;;  %622 = vmatpush.msra.mxu3 %v339_v17 }
  0x1f   :  { %355 = vmatpush.msra.mxu1 %v338_v18  ;;  %623 = vmatpush.msra.mxu3 %v338_v18 }
  0x20   :  { %613 = vmatpush.bf16.msra.mxu2 %v557_v4  ;;  %233 = vmatpush.bf16.msra.mxu0 %v557_v4 }
  0x21   :  { %356 = vmatpush.msra.mxu1 %v337_v21  ;;  %624 = vmatpush.msra.mxu3 %v337_v21 }
  0x23   :  { %357 = vmatpush.msra.mxu1 %v336_v22  ;;  %625 = vmatpush.msra.mxu3 %v336_v22 }
  0x24   :  { %614 = vmatpush.bf16.msra.mxu2 %v556_v5  ;;  %234 = vmatpush.bf16.msra.mxu0 %v556_v5 }
  0x25   :  { %358 = vmatpush.msra.mxu1 %v335_v23  ;;  %626 = vmatpush.msra.mxu3 %v335_v23 }
  0x27   :  { %359 = vmatpush.msra.mxu1 %v334_v24  ;;  %627 = vmatpush.msra.mxu3 %v334_v24 }
  0x28   :  { %615 = vmatpush.bf16.msra.mxu2 %v555_v6  ;;  %235 = vmatpush.bf16.msra.mxu0 %v555_v6 }
  0x29   :  { %360 = vmatpush.msra.mxu1 %v333_v25  ;;  %628 = vmatpush.msra.mxu3 %v333_v25 }
  0x2b   :  { %361 = vmatpush.msra.mxu1 %v332_v26  ;;  %629 = vmatpush.msra.mxu3 %v332_v26 }
  0x2c   :  { %616 = vmatpush.bf16.msra.mxu2 %v554_v7  ;;  %236 = vmatpush.bf16.msra.mxu0 %v554_v7 }
  0x2d   :  { %362 = vmatpush.msra.mxu1 %v331_v27  ;;  %630 = vmatpush.msra.mxu3 %v331_v27 }
  0x2f   :  { %257 = vmatmul.bf16.vlgmr.msra.gmra.mxu2 %v550_v8  ;;  %237 = vmatmul.bf16.vlgmr.msra.gmra.mxu0 %v546_v9 }
  0x30   :  { %363 = vmatpush.msra.mxu1 %v330_v28  ;;  %631 = vmatpush.msra.mxu3 %v330_v28 }
  0x32   :  { %364 = vmatpush.msra.mxu1 %v329_v31  ;;  %632 = vmatpush.msra.mxu3 %v329_v31 }
  0x3f   :  { %262 = vmatmul.bf16.gmra.mxu2 %v551_v10  ;;  %242 = vmatmul.bf16.gmra.mxu0 %v547_v11 }
  0x4f   :  { %267 = vmatmul.bf16.gmra.mxu2 %v552_v19  ;;  %247 = vmatmul.bf16.gmra.mxu0 %v548_v20 }
  0x5f   :  { %272 = vmatmul.bf16.gmra.mxu2 %v553_v29  ;;  %252 = vmatmul.bf16.gmra.mxu0 %v549_v30 }
  0xac   :  { %v238_v32 = vpop.f32.mrf.mxu0 }
  0xad   :  { %365 = vmatmul.f32.vlgmr.msra.gmra.mxu1 %v238_v32 }
  0xb2   :  { %v258_v33 = vpop.f32.mrf.mxu2 }
  0xb3   :  { %389 = vmatmul.f32.vlgmr.msra.gmra.mxu3 %v258_v33 }
  0xb4   :  { %v240_v34 = vpop.f32.mrf.mxu0 }
  0xb5   :  { %368 = vmatmul.f32.gmra.mxu1 %v240_v34 }
  0xba   :  { %v260_v35 = vpop.f32.mrf.mxu2 }
  0xbb   :  { %392 = vmatmul.f32.gmra.mxu3 %v260_v35 }
  0xbc   :  { %v243_v36 = vpop.f32.mrf.mxu0 }
  0xbd   :  { %371 = vmatmul.f32.gmra.mxu1 %v243_v36 }
  0xc2   :  { %v263_v37 = vpop.f32.mrf.mxu2 }
  0xc3   :  { %395 = vmatmul.f32.gmra.mxu3 %v263_v37 }
  0xc4   :  { %v245_v38 = vpop.f32.mrf.mxu0 }
  0xc5   :  { %374 = vmatmul.f32.gmra.mxu1 %v245_v38 }
  0xca   :  { %v265_v39 = vpop.f32.mrf.mxu2 }
  0xcb   :  { %398 = vmatmul.f32.gmra.mxu3 %v265_v39 }
  0xcc   :  { %v248_v40 = vpop.f32.mrf.mxu0 }
  0xcd   :  { %377 = vmatmul.f32.gmra.mxu1 %v248_v40 }
  0xd2   :  { %v268_v41 = vpop.f32.mrf.mxu2 }
  0xd3   :  { %401 = vmatmul.f32.gmra.mxu3 %v268_v41 }
  0xd4   :  { %v250_v42 = vpop.f32.mrf.mxu0 }
  0xd5   :  { %380 = vmatmul.f32.gmra.mxu1 %v250_v42 }
  0xda   :  { %v270_v43 = vpop.f32.mrf.mxu2 }
  0xdb   :  { %404 = vmatmul.f32.gmra.mxu3 %v270_v43 }
  0xdc   :  { %v253_v44 = vpop.f32.mrf.mxu0 }
  0xdd   :  { %383 = vmatmul.f32.gmra.mxu1 %v253_v44 }
  0xe2   :  { %v273_v45 = vpop.f32.mrf.mxu2 }
  0xe3   :  { %407 = vmatmul.f32.gmra.mxu3 %v273_v45 }
  0xe4   :  { %v255_v46 = vpop.f32.mrf.mxu0 }
  0xe5   :  { %386 = vmatmul.f32.gmra.mxu1 %v255_v46 }
  0xea   :  { %v275_v47 = vpop.f32.mrf.mxu2 }
  0xeb   :  { %410 = vmatmul.f32.gmra.mxu3 %v275_v47 }
 0x12a   :  { %v366_v48 = vpop.f32.mrf.mxu1 }
 0x12b   :  { %v367_v50 = vadd.f32 %v641_v49, %v366_v48 }
 0x12d   :  { %v414_v52 = vmax.f32 %v367_v50, 0.0 }
 0x132   :  { %v369_v51 = vpop.f32.mrf.mxu1 }
 0x133   :  { %v370_v53 = vadd.f32 %v641_v49, %v369_v51 }
 0x135   :  { %v415_v54 = vmax.f32 %v370_v53, 0.0 }
 0x136   :  { %v390_v55 = vpop.f32.mrf.mxu3 }
 0x137   :  { %v565_v56 = vpack.c.bf16 %v415_v54, %v414_v52  ;;  %v391_v58 = vadd.f32 %v641_v49, %v390_v55 }
 0x139   :  { %566 = vst [vmem:[#allocation9] sm:$0xff] %v565_v56   ;;  %v422_v62 = vmax.f32 %v391_v58, 0.0 }
 0x13a   :  { %v372_v57 = vpop.f32.mrf.mxu1 }
 0x13b   :  { %v373_v60 = vadd.f32 %v641_v49, %v372_v57 }
 0x13d   :  { %v416_v1 = vmax.f32 %v373_v60, 0.0 }
 0x13e   :  { %v393_v59 = vpop.f32.mrf.mxu3 }
 0x13f   :  { %v394_v61 = vadd.f32 %v641_v49, %v393_v59 }
 0x141   :  { %v423_v63 = vmax.f32 %v394_v61, 0.0 }
 0x142   :  { %v375_v0 = vpop.f32.mrf.mxu1 }
 0x143   :  { %v585_v2 = vpack.c.bf16 %v423_v63, %v422_v62  ;;  %v376_v3 = vadd.f32 %v641_v49, %v375_v0 }
 0x145   :  { %605 = vst [vmem:[#allocation9 + $0x20] sm:$0xff] %v585_v2   ;;  %v417_v4 = vmax.f32 %v376_v3, 0.0 }
 0x146   :  { %v396_v5 = vpop.f32.mrf.mxu3 }
 0x147   :  { %v570_v6 = vpack.c.bf16 %v417_v4, %v416_v1  ;;  %v397_v8 = vadd.f32 %v641_v49, %v396_v5 }
 0x149   :  { %602 = vst [vmem:[#allocation9 + $0x8] sm:$0xff] %v570_v6   ;;  %v424_v12 = vmax.f32 %v397_v8, 0.0 }
 0x14a   :  { %v378_v7 = vpop.f32.mrf.mxu1 }
 0x14b   :  { %v379_v10 = vadd.f32 %v641_v49, %v378_v7 }
 0x14d   :  { %v418_v15 = vmax.f32 %v379_v10, 0.0 }
 0x14e   :  { %v399_v9 = vpop.f32.mrf.mxu3 }
 0x14f   :  { %v400_v11 = vadd.f32 %v641_v49, %v399_v9 }
 0x151   :  { %v425_v13 = vmax.f32 %v400_v11, 0.0 }
 0x152   :  { %v381_v14 = vpop.f32.mrf.mxu1 }
 0x153   :  { %v590_v16 = vpack.c.bf16 %v425_v13, %v424_v12  ;;  %v382_v17 = vadd.f32 %v641_v49, %v381_v14 }
 0x155   :  { %606 = vst [vmem:[#allocation9 + $0x28] sm:$0xff] %v590_v16   ;;  %v419_v18 = vmax.f32 %v382_v17, 0.0 }
 0x156   :  { %v402_v19 = vpop.f32.mrf.mxu3 }
 0x157   :  { %v575_v20 = vpack.c.bf16 %v419_v18, %v418_v15  ;;  %v403_v22 = vadd.f32 %v641_v49, %v402_v19 }
 0x159   :  { %603 = vst [vmem:[#allocation9 + $0x10] sm:$0xff] %v575_v20   ;;  %v426_v26 = vmax.f32 %v403_v22, 0.0 }
 0x15a   :  { %v384_v21 = vpop.f32.mrf.mxu1 }
 0x15b   :  { %v385_v24 = vadd.f32 %v641_v49, %v384_v21 }
 0x15d   :  { %v420_v29 = vmax.f32 %v385_v24, 0.0 }
 0x15e   :  { %v405_v23 = vpop.f32.mrf.mxu3 }
 0x15f   :  { %v406_v25 = vadd.f32 %v641_v49, %v405_v23 }
 0x161   :  { %v427_v27 = vmax.f32 %v406_v25, 0.0 }
 0x162   :  { %v387_v28 = vpop.f32.mrf.mxu1 }
 0x163   :  { %v595_v30 = vpack.c.bf16 %v427_v27, %v426_v26  ;;  %v388_v31 = vadd.f32 %v641_v49, %v387_v28 }
 0x165   :  { %607 = vst [vmem:[#allocation9 + $0x30] sm:$0xff] %v595_v30   ;;  %v421_v32 = vmax.f32 %v388_v31, 0.0 }
 0x166   :  { %v408_v33 = vpop.f32.mrf.mxu3 }
 0x167   :  { %v580_v34 = vpack.c.bf16 %v421_v32, %v420_v29  ;;  %v409_v35 = vadd.f32 %v641_v49, %v408_v33 }
 0x169   :  { %604 = vst [vmem:[#allocation9 + $0x18] sm:$0xff] %v580_v34   ;;  %v428_v38 = vmax.f32 %v409_v35, 0.0 }
 0x16e   :  { %v411_v36 = vpop.f32.mrf.mxu3 }
 0x16f   :  { %v412_v37 = vadd.f32 %v641_v49, %v411_v36 }
 0x171   :  { %v429_v39 = vmax.f32 %v412_v37, 0.0 }
 0x173   :  { %v600_v40 = vpack.c.bf16 %v429_v39, %v428_v38 }
 0x175   :  { %608 = vst [vmem:[#allocation9 + $0x38] sm:$0xff] %v600_v40  }
 0x176   :  { %474 = dma.vmem_to_hbm [thread:$0]  %s467_s7, 1024, %s469_s10, [#allocation5], %s745_s23, %s745_s23, %s746_s24  }
 0x177   :  { %742 = dma.done.wait [#allocation5], 1024  }
 0x178   :  { %743 = vsyncadd [#allocation5], 4294966272 }
 0x179   :  { %479 = vsyncpa [#allocation4], 1 }
 0x17a   :  { %480 = vsyncpa [#allocation7], 1 }
 0x17b   :  { %481 = vsyncpa [#allocation5], 1 }

</bundles_post_ra>
